<compile_context>
chip_gen: v7x
topology: tpu7x:2x2x1
jax: 0.10.0
libtpu: 0.0.40
codegen_flags: <defaults>
</compile_context>

<pallas_src>
import jax
import jax.numpy as jnp
import numpy as np
from jax.experimental import pallas as pl
from jax.experimental.pallas import tpu as pltpu

# ---- model hyperparameters (small, consistent with the module) ----
K = 4            # number of mixture components
P = 3            # dimension of x
D = 5            # dimension of theta (conditioning variable)
HIDDEN = [32, 32]
B = 16           # flattened batch size

H1, H2 = HIDDEN
OUT_COLS = 2 * K * P           # 24

# Row offsets of each tensor inside the packed (96, 128) buffer.
# Every tensor starts on an 8-row boundary; unused rows/cols are zero.
_R_W1 = 0      # (D,  H1)  rows 0..7
_R_B1 = 8      # (1,  H1)  rows 8..15
_R_W2 = 16     # (H1, H2)  rows 16..47
_R_B2 = 48     # (1,  H2)  rows 48..55
_R_W3 = 56     # (H2, 2KP) rows 56..87   (column-permuted, k-major [m | log_s])
_R_B3 = 88     # (1,  2KP) rows 88..95
_PACK_ROWS = 96
_PACK_COLS = 128


def _cls_kernel(x_ref, theta_ref, pk_ref, out_ref):
    """Fused MLP (2 hidden tanh layers) + location/scale normalization.

    pk_ref holds all weights/biases at static (8,128)-aligned offsets; the
    last layer is column-permuted so net[:, :K*P] == all m's (k-major) and
    net[:, K*P:] == all log_s's (k-major).
    """
    w1 = pk_ref[_R_W1:_R_W1 + D,  :H1]        # (D,  H1)
    b1 = pk_ref[_R_B1:_R_B1 + 1,  :H1]        # (1,  H1)
    w2 = pk_ref[_R_W2:_R_W2 + H1, :H2]        # (H1, H2)
    b2 = pk_ref[_R_B2:_R_B2 + 1,  :H2]        # (1,  H2)
    w3 = pk_ref[_R_W3:_R_W3 + H2, :OUT_COLS]  # (H2, 2*K*P)
    b3 = pk_ref[_R_B3:_R_B3 + 1,  :OUT_COLS]  # (1,  2*K*P)

    # MLP over theta: matmuls hit the MXU, accumulate in f32.
    h = jnp.tanh(jnp.dot(theta_ref[...], w1,
                         preferred_element_type=jnp.float32) + b1)
    h = jnp.tanh(jnp.dot(h, w2,
                         preferred_element_type=jnp.float32) + b2)
    net = jnp.dot(h, w3,
                  preferred_element_type=jnp.float32) + b3          # (B, 2*K*P)

    m = net[:, :K * P]                         # (B, K*P)  contiguous
    log_s = net[:, K * P:]                     # (B, K*P)  contiguous
    # Broadcast x along K inside the kernel (XLU shuffles = free filler);
    # never pre-tile on the host (would 4x x's DMA bytes).
    x_t = jnp.tile(x_ref[...], (1, K))         # (B, K*P)

    # One lane-contiguous store (masked at 12 lanes -- fine at this size);
    # exp(-log_s) avoids a separate divide.
    out_ref[...] = (x_t - m) * jnp.exp(-log_s)


def pack_params(params):
    """One-time host-side prep: permute the last layer to k-major [m | log_s]
    and pack all six tensors into a single (96, 128) f32 buffer."""
    w1, b1, w2, b2, w3, b3 = (np.asarray(p, np.float32) for p in params)

    # Original column c of layer 3 encodes (k = c // (2P), m if (c % 2P) < P).
    perm_m = np.array([k * 2 * P + j for k in range(K) for j in range(P)])
    perm_s = np.array([k * 2 * P + P + j for k in range(K) for j in range(P)])
    perm = np.concatenate([perm_m, perm_s])
    w3p, b3p = w3[:, perm], b3[:, perm]

    buf = np.zeros((_PACK_ROWS, _PACK_COLS), np.float32)
    buf[_R_W1:_R_W1 + D,  :H1] = w1
    buf[_R_B1,            :H1] = b1[0]
    buf[_R_W2:_R_W2 + H1, :H2] = w2
    buf[_R_B2,            :H2] = b2[0]
    buf[_R_W3:_R_W3 + H2, :OUT_COLS] = w3p
    buf[_R_B3,            :OUT_COLS] = b3p[0]
    return jnp.asarray(buf)


@jax.jit
def conditional_location_scale_forward(x, theta, packed_params):
    """x: (B, P) f32, theta: (B, D) f32, packed_params: (96, 128) f32
    -> (B, K, P) f32."""
    bsz = x.shape[0]
    # Whole problem in one grid-less VMEM-resident step (B=16); explicit
    # full-array BlockSpecs pinned to VMEM document residency and give the
    # hook for block shapes / pipeline_mode when a batch grid lands.
    out2d = pl.pallas_call(
        _cls_kernel,
        out_shape=jax.ShapeDtypeStruct((bsz, K * P), jnp.float32),
        in_specs=[
            pl.BlockSpec(memory_space=pltpu.MemorySpace.VMEM),   # x
            pl.BlockSpec(memory_space=pltpu.MemorySpace.VMEM),   # theta
            pl.BlockSpec(memory_space=pltpu.MemorySpace.VMEM),   # packed weights
        ],
        out_specs=pl.BlockSpec(memory_space=pltpu.MemorySpace.VMEM),
    )(x, theta, packed_params)

    # (B, K*P) slab -> (B, K, P) in the wrapper (free layout plumbing).
    return out2d.reshape(bsz, K, P)


def init_params(key):
    """Deterministic init mimicking torch.nn.Linear (uniform +-1/sqrt(fan_in))."""
    dims = [D] + HIDDEN + [2 * K * P]
    params = []
    for h0, h1 in zip(dims, dims[1:]):
        key, kw, kb = jax.random.split(key, 3)
        bound = 1.0 / jnp.sqrt(h0)
        w = jax.random.uniform(kw, (h0, h1), jnp.float32, -bound, bound)
        b = jax.random.uniform(kb, (1, h1), jnp.float32, -bound, bound)
        params += [w, b]
    return tuple(params)


def reference_forward(x, theta, params):
    """Pure-JAX reference matching the PyTorch module (unpacked params)."""
    w1, b1, w2, b2, w3, b3 = params
    h = jnp.tanh(theta @ w1 + b1)
    h = jnp.tanh(h @ w2 + b2)
    out = h @ w3 + b3                                   # (B, 2*K*P)
    out = out.reshape(out.shape[0], K, 2 * P)
    m, log_s = out[..., :P], out[..., P:]
    X = x[:, None, :]
    return (X - m) / jnp.exp(log_s)


if __name__ == "__main__":
    key = jax.random.PRNGKey(0)
    kp, kx, kt = jax.random.split(key, 3)
    params = init_params(kp)
    packed = pack_params(params)                        # one-time, host-side

    x = jax.random.normal(kx, (B, P), jnp.float32)
    theta = jax.random.normal(kt, (B, D), jnp.float32)

    out = conditional_location_scale_forward(x, theta, packed)
    out = jax.block_until_ready(out)

    ref = reference_forward(x, theta, params)
    assert out.shape == (B, K, P)
    assert jnp.allclose(out, ref, atol=1e-5, rtol=1e-5), (
        f"max abs err {jnp.max(jnp.abs(out - ref))}")
    print("KERNEL_OK")
</pallas_src>

<mosaic_0001>
module attributes {stable_mosaic.version = 11 : i64} {
  func.func @_cls_kernel(%arg0: memref<16x3xf32, #tpu.memory_space<vmem>>, %arg1: memref<16x5xf32, #tpu.memory_space<vmem>>, %arg2: memref<96x128xf32, #tpu.memory_space<vmem>>, %arg3: memref<16x12xf32, #tpu.memory_space<vmem>>) attributes {dimension_semantics = [], scalar_prefetch = 0 : i64, scratch_operands = 0 : i64, tpu.core_type = #tpu.core_type<tc>} {
    %c0 = arith.constant 0 : index
    %c0_0 = arith.constant 0 : index
    %0 = vector.load %arg2[%c0, %c0_0] : memref<96x128xf32, #tpu.memory_space<vmem>>, vector<5x32xf32>
    %c8 = arith.constant 8 : index
    %c0_1 = arith.constant 0 : index
    %1 = vector.load %arg2[%c8, %c0_1] : memref<96x128xf32, #tpu.memory_space<vmem>>, vector<1x32xf32>
    %c16 = arith.constant 16 : index
    %c0_2 = arith.constant 0 : index
    %2 = vector.load %arg2[%c16, %c0_2] : memref<96x128xf32, #tpu.memory_space<vmem>>, vector<32x32xf32>
    %c48 = arith.constant 48 : index
    %c0_3 = arith.constant 0 : index
    %3 = vector.load %arg2[%c48, %c0_3] : memref<96x128xf32, #tpu.memory_space<vmem>>, vector<1x32xf32>
    %c56 = arith.constant 56 : index
    %c0_4 = arith.constant 0 : index
    %4 = vector.load %arg2[%c56, %c0_4] : memref<96x128xf32, #tpu.memory_space<vmem>>, vector<32x24xf32>
    %c88 = arith.constant 88 : index
    %c0_5 = arith.constant 0 : index
    %5 = vector.load %arg2[%c88, %c0_5] : memref<96x128xf32, #tpu.memory_space<vmem>>, vector<1x24xf32>
    %c0_6 = arith.constant 0 : index
    %c0_7 = arith.constant 0 : index
    %6 = vector.load %arg1[%c0_6, %c0_7] : memref<16x5xf32, #tpu.memory_space<vmem>>, vector<16x5xf32>
    %cst = arith.constant dense<0.000000e+00> : vector<16x32xf32>
    %7 = tpu.matmul %6, %0, %cst {dimension_numbers = #tpu.dot_dimension_numbers<[1], [0], [0], [1], [0, 0, 1, 1], [], []>} : vector<16x5xf32>, vector<5x32xf32>, vector<16x32xf32> -> vector<16x32xf32>
    %8 = vector.broadcast %1 : vector<1x32xf32> to vector<16x32xf32>
    %9 = arith.addf %7, %8 : vector<16x32xf32>
    %10 = math.tanh %9 : vector<16x32xf32>
    %cst_8 = arith.constant dense<0.000000e+00> : vector<16x32xf32>
    %11 = tpu.matmul %10, %2, %cst_8 {dimension_numbers = #tpu.dot_dimension_numbers<[1], [0], [0], [1], [0, 0, 1, 1], [], []>} : vector<16x32xf32>, vector<32x32xf32>, vector<16x32xf32> -> vector<16x32xf32>
    %12 = vector.broadcast %3 : vector<1x32xf32> to vector<16x32xf32>
    %13 = arith.addf %11, %12 : vector<16x32xf32>
    %14 = math.tanh %13 : vector<16x32xf32>
    %cst_9 = arith.constant dense<0.000000e+00> : vector<16x24xf32>
    %15 = tpu.matmul %14, %4, %cst_9 {dimension_numbers = #tpu.dot_dimension_numbers<[1], [0], [0], [1], [0, 0, 1, 1], [], []>} : vector<16x32xf32>, vector<32x24xf32>, vector<16x24xf32> -> vector<16x24xf32>
    %16 = vector.broadcast %5 : vector<1x24xf32> to vector<16x24xf32>
    %17 = arith.addf %15, %16 : vector<16x24xf32>
    %18 = vector.extract_strided_slice %17 {offsets = [0, 0], sizes = [16, 12], strides = [1, 1]} : vector<16x24xf32> to vector<16x12xf32>
    %19 = vector.extract_strided_slice %17 {offsets = [0, 12], sizes = [16, 12], strides = [1, 1]} : vector<16x24xf32> to vector<16x12xf32>
    %c0_10 = arith.constant 0 : index
    %c0_11 = arith.constant 0 : index
    %20 = vector.load %arg0[%c0_10, %c0_11] : memref<16x3xf32, #tpu.memory_space<vmem>>, vector<16x3xf32>
    %21 = tpu.concatenate %20, %20, %20, %20 in 1 : vector<16x3xf32>, vector<16x3xf32>, vector<16x3xf32>, vector<16x3xf32> -> vector<16x12xf32>
    %22 = arith.subf %21, %18 : vector<16x12xf32>
    %cst_12 = arith.constant 0.000000e+00 : f32
    %23 = vector.broadcast %cst_12 : f32 to vector<16x12xf32>
    %24 = arith.subf %23, %19 : vector<16x12xf32>
    %25 = math.exp %24 : vector<16x12xf32>
    %26 = arith.mulf %22, %25 : vector<16x12xf32>
    %c0_13 = arith.constant 0 : index
    %c0_14 = arith.constant 0 : index
    %27 = vector.load %arg3[%c0_13, %c0_14] : memref<16x12xf32, #tpu.memory_space<vmem>>, vector<16x12xf32>
    tpu.vector_store %arg3[%c0_13, %c0_14], %26 {strides = array<i32>} : memref<16x12xf32, #tpu.memory_space<vmem>>, vector<16x12xf32>,
    return
  }
}

</mosaic_0001>

<bundles_post_ra>
// kernel: conditional_location_scale_forward.1
= control target key start
LH: loop header
LB: loop body
LE: loop exit
PB: predicated region body
PF: predicated region fallthrough
CT: control target
= control target key end

     0   :  { %8 = vsyncpa [#allocation3], 0  ;;  %s475_s12 = smov [#allocation2]   ;;  %s536_s0 = inlined_call_operand.vmem [shape: f32[16,3], index: 0, kind: input, shape index: {}]   ;;  %s537_s1 = inlined_call_operand.vmem [shape: f32[16,5], index: 1, kind: input, shape index: {}]   ;;  %s538_s2 = inlined_call_operand.hbm [shape: f32[96,128], index: 2, kind: input, shape index: {}]   ;;  %s539_s3 = inlined_call_operand.vmem [shape: f32[16,12], index: 3, kind: output, shape index: {}]  }
   0x1   :  { %s18_s13 = sshll.u32 %s475_s12, 4  ;;  %s451_s16 = scalar_lea.hbm %s538_s2, 1536  ;;  %s19_s13 = int_to_ptr.vmem [resolvable:$true] %s18_s13 }
   0x2   :  { %p452_p0 = scmp.ne.s32.totalorder %s538_s2, %s451_s16  ;;  %p455_p1 = scmp.lt.u32.totalorder %s451_s16, %s538_s2 }
   0x4   :  { %p457_p2 = pnand %p455_p1, %p452_p0 }
   0x6   :  { %460 = shalt.err (!%p457_p2)
}
   0x7   :  { %s461_s21 = scalar_lea.vmem %s19_s13, 1536  ;;  %p466_p4 = scmp.lt.s32.totalorder %s19_s13, %s19_s13 }
   0x8   :  { %p462_p3 = scmp.ne.s32.totalorder %s19_s13, %s461_s21  ;;  %p467_p5 = scmp.lt.s32.totalorder %s461_s21, %s461_s21 }
   0xa   :  { %p468_p6 = por %p467_p5, %p466_p4 }
   0xc   :  { %p469_p7 = pnand %p468_p6, %p462_p3 }
   0xe   :  { %472 = shalt.err (!%p469_p7)
}
   0xf   :  { %s476_s22 = smov 128   ;;  %s477_s23 = smov 8  }
  0x10   :  { %24 = dma.hbm_to_vmem [thread:$0]  %s538_s2, 1536, %s19_s13, [#allocation3], %s476_s22, %s476_s22, %s477_s23  }
  0x11   :  { %473 = dma.done.wait [#allocation3], 1536  }
  0x12   :  { %474 = vsyncadd [#allocation3], 4294965760  ;;  %vm53_vm0 = vcmask 1044480   ;;  %vm46_vm1 = vcmask 39936   ;;  %v28_v0 = vld [vmem:[#allocation2] sm:$0x1f] }
  0x13   :  { %v40_v1 = vld [vmem:[%s537_s1] sm:$0xff]  ;;  %v41_v2 = vld [vmem:[%s537_s1 + $0x8] sm:$0xff]  ;;  %389 = vmatprep.subr.msk.mxu0 %vm53_vm0, %v28_v0  ;;  %v30_v3 = vld [vmem:[#allocation2 + $0x10] sm:$0xff]  ;;  %vm138_vm2 = vcmask 261120   ;;  %s478_s30 = smov 6   ;;  %s479_s4 = smov 3  }
  0x14   :  { %391 = vmatprep.mubr.msk.f32.mxu0 %vm46_vm1, %v40_v1  ;;  %390 = vmatpush3.msk.msra.mxu0 %vm53_vm0, %v28_v0  ;;  %v31_v4 = vld [vmem:[#allocation2 + $0x18] sm:$0xff]  ;;  %v32_v5 = vld [vmem:[#allocation2 + $0x20] sm:$0xff]  ;;  %v33_v7 = vld [vmem:[#allocation2 + $0x28] sm:$0xff]  ;;  %s480_s7 = smov 9   ;;  %vm329_vm3 = vcmask 23552   ;;  %vm332_vm4 = vcmask 48128  }
  0x15   :  { %392 = vmatmul.mubr.msk.f32.vlgmr.msra.gmra.mrb[0].mxu0 %vm46_vm1, %v41_v2  ;;  %v416_v6 = vpack.c.bf16 %v31_v4, %v30_v3  ;;  %v420_v8 = vpack.c.bf16 %v33_v7, %v32_v5  ;;  %v364_v9 = vld [vmem:[#allocation2 + $0x8] ss:$0 sm:$0xff]  ;;  %v35_v16 = vld [vmem:[#allocation2 + $0x38] sm:$0xff]  ;;  %v36_v17 = vld [vmem:[#allocation2 + $0x40] sm:$0xff]  ;;  %vm335_vm5 = vcmask 72704   ;;  %vm356_vm6 = vcmask 97280  }
  0x16   :  { %v37_v18 = vld [vmem:[#allocation2 + $0x48] sm:$0xff]  ;;  %v424_v19 = vpack.c.bf16 %v36_v17, %v35_v16  ;;  %v38_v20 = vld [vmem:[#allocation2 + $0x50] sm:$0xff]  ;;  %v307_v22 = vld [vmem:[%s536_s0] sm:$0xff] }
  0x17   :  { %417 = vmatprep.subr.bf16.mxu1 %v416_v6  ;;  %v428_v21 = vpack.c.bf16 %v38_v20, %v37_v18  ;;  %317 = vrot.lane.b32.xlu1 %v307_v22, %s478_s30  ;;  %v308_v23 = vld [vmem:[%s536_s0 + $0x8] sm:$0xff]  ;;  %v368_v24 = vld [vmem:[#allocation2 + $0x30] ss:$0 sm:$0xff]  ;;  %v371_v31 = vld [vmem:[#allocation2 + $0x58] ss:$0 sm:$0xff]  ;;  %s481_s0 = smov 116  }
  0x18   :  { %419 = vmatpush3.bf16.msra.mxu1 %v416_v6  ;;  %425 = vmatprep.subr.bf16.mxu0 %v424_v19 }
  0x19   :  { %421 = vmatprep.subr.bf16.mxu1 %v420_v8  ;;  %427 = vmatpush3.bf16.msra.mxu0 %v424_v19 }
  0x1a   :  { %429 = vmatprep.subr.bf16.mxu0 %v428_v21  ;;  %311 = vrot.lane.b32.xlu0 %v307_v22, %s479_s4 }
  0x1b   :  { %319 = vrot.lane.b32.xlu1 %v308_v23, %s478_s30 }
  0x1c   :  { %423 = vmatpush3.bf16.msra.mxu1 %v420_v8 }
  0x1d   :  { %431 = vmatpush3.bf16.msra.mxu0 %v428_v21 }
  0x1e   :  { %313 = vrot.lane.b32.xlu0 %v308_v23, %s479_s4 }
  0x1f   :  { %325 = vrot.lane.b32.xlu1 %v308_v23, %s480_s7 }
  0x22   :  { %323 = vrot.lane.b32.xlu0 %v307_v22, %s480_s7 }
  0x89   :  { %v318_v42 = vpop.permute.xlu1 %317 }
  0x8c   :  { %v312_v43 = vpop.permute.xlu0 %311 }
  0x8d   :  { %v320_v44 = vpop.permute.xlu1 %319  ;;  %v330_v47 = vsel %vm329_vm3, %v307_v22, %v312_v43 }
  0x8e   :  { %v333_v50 = vsel %vm332_vm4, %v330_v47, %v318_v42 }
  0x90   :  { %v314_v45 = vpop.permute.xlu0 %313 }
  0x91   :  { %v331_v46 = vsel %vm329_vm3, %v308_v23, %v314_v45  ;;  %v326_v48 = vpop.permute.xlu1 %325 }
  0x92   :  { %v334_v49 = vsel %vm332_vm4, %v331_v46, %v320_v44 }
  0x93   :  { %v337_v52 = vsel %vm335_vm5, %v334_v49, %v326_v48 }
  0x94   :  { %v324_v51 = vpop.permute.xlu0 %323 }
  0x95   :  { %v336_v53 = vsel %vm335_vm5, %v333_v50, %v324_v51 }
  0xe8   :  { %v393_v10 = vpop.f32.mrb[0].mxu0 }
  0xe9   :  { %v129_v11 = vadd.f32 %v393_v10, %v364_v9  ;;  %v123_v12 = vpop.f32.mrb[1].mxu0 }
  0xea   :  { %v124_v13 = vadd.f32 %v364_v9, %v123_v12 }
  0xec   :  { %439 = vtanh.f32 %v124_v13 }
  0xed   :  { %441 = vtanh.f32 %v129_v11 }
  0xf6   :  { %v440_v14 = vpop.eup %439 }
  0xf7   :  { %v442_v15 = vpop.eup %441  ;;  %402 = vmatprep.mubr.msk.f32.mxu1 %vm138_vm2, %v440_v14 }
  0xf8   :  { %403 = vmatmul.mubr.msk.f32.vlgmr.msra.gmra.mrb[0].mxu1 %vm138_vm2, %v442_v15 }
 0x1cb   :  { %v404_v25 = vpop.f32.mrb[0].mxu1 }
 0x1cc   :  { %v217_v26 = vadd.f32 %v404_v25, %v368_v24  ;;  %v211_v27 = vpop.f32.mrb[1].mxu1 }
 0x1cd   :  { %v212_v28 = vadd.f32 %v368_v24, %v211_v27 }
 0x1cf   :  { %443 = vtanh.f32 %v212_v28 }
 0x1d0   :  { %445 = vtanh.f32 %v217_v26 }
 0x1d9   :  { %v444_v29 = vpop.eup %443 }
 0x1da   :  { %v446_v30 = vpop.eup %445  ;;  %413 = vmatprep.mubr.msk.f32.mxu0 %vm138_vm2, %v444_v29 }
 0x1db   :  { %414 = vmatmul.mubr.msk.f32.vlgmr.msra.gmra.mrb[2].mxu0 %vm138_vm2, %v446_v30 }
 0x2ae   :  { %v415_v32 = vpop.f32.mrb[2].mxu0 }
 0x2af   :  { %v304_v33 = vadd.f32 %v415_v32, %v371_v31  ;;  %v298_v34 = vpop.f32.mrb[3].mxu0 }
 0x2b0   :  { %v299_v35 = vadd.f32 %v371_v31, %v298_v34 }
 0x2b1   :  { %v341_v36 = vsub.f32 0.0, %v304_v33  ;;  %v339_v54 = vsub.f32 %v337_v52, %v304_v33 }
 0x2b2   :  { %v340_v37 = vsub.f32 0.0, %v299_v35  ;;  %v338_v56 = vsub.f32 %v336_v53, %v299_v35 }
 0x2b3   :  { %v344_v38 = vmul.f32 1.442695, %v341_v36 }
 0x2b4   :  { %v342_v39 = vmul.f32 1.442695, %v340_v37 }
 0x2b5   :  { %447 = vpow2.f32 %v344_v38 }
 0x2b6   :  { %449 = vpow2.f32 %v342_v39 }
 0x2bf   :  { %v448_v40 = vpop.eup %447 }
 0x2c0   :  { %v450_v41 = vpop.eup %449  ;;  %350 = vrot.lane.b32.xlu1 %v448_v40, %s481_s0 }
 0x2c1   :  { %348 = vrot.lane.b32.xlu0 %v450_v41, %s481_s0 }
 0x332   :  { %v351_v55 = vpop.permute.xlu1 %350 }
 0x333   :  { %v355_v57 = vmul.f32 %v351_v55, %v339_v54  ;;  %v349_v58 = vpop.permute.xlu0 %348 }
 0x334   :  { %v354_v59 = vmul.f32 %v349_v58, %v338_v56 }
 0x335   :  { %358 = vst.msk [vmem:[%s539_s3 + $0x8] sm:$0xff] %vm356_vm6, %v355_v57 }
 0x336   :  { %357 = vst.msk [vmem:[%s539_s3] sm:$0xff] %vm356_vm6, %v354_v59 }
 0x337   :  { %363 = vsyncpa [#allocation3], 1 }

</bundles_post_ra>
